<compile_context>
chip_gen: v7x
topology: tpu7x:2x2x1
jax: 0.10.0
libtpu: 0.0.40
codegen_flags: <defaults>
</compile_context>

<pallas_src>
import jax
import jax.numpy as jnp
from jax.experimental import pallas as pl
from jax.experimental.pallas import tpu as pltpu


# ---------------------------------------------------------------------------
# forward(): identity over the parameters — no Pallas kernel (zero cost).
# ---------------------------------------------------------------------------
def reasoning_components_forward(components, reasonings):
    """Pallas/JAX equivalent of ReasoningComponents.forward() (pure identity)."""
    return components, reasonings


def reasonings_to_pnc(reasonings_nc2):
    """One-time layout change (N, C, 2) -> (2, N, C).

    Do this when the parameter is created/updated, NOT per reasoning_matrices
    call, so the hot path never pays strided minor-dim slices.
    """
    return jnp.transpose(reasonings_nc2, (2, 0, 1))


# ---------------------------------------------------------------------------
# reasoning_matrices: lane-dense elementwise kernel.
# ---------------------------------------------------------------------------
def _reasoning_matrices_kernel(pn_ref, mat_ref):
    # pn_ref : (2, TN, L)  — p = pn_ref[0], n = pn_ref[1]; L on the lane axis.
    # mat_ref: (3, TN, L)  — three full (TN, L) slabs, unmasked lane-dense vst.
    pk = jnp.clip(pn_ref[0], 0.0, 1.0)
    nk = (1.0 - pk) * jnp.clip(pn_ref[1], 0.0, 1.0)
    mat_ref[0] = pk.astype(mat_ref.dtype)
    mat_ref[1] = nk.astype(mat_ref.dtype)
    mat_ref[2] = (1.0 - pk - nk).astype(mat_ref.dtype)


def _vmem_budget():
    """Generation-aware VMEM budget for the double-buffered streaming tiles."""
    budget, vmem_limit, max_rows = 16 << 20, None, 1024          # v7x-safe default
    try:
        # v5e/v6e have 128 MiB physical VMEM -> allow ~2x bigger streaming
        # tiles and raise the scoped limit above the 32 MiB default.
        if pltpu.get_tpu_info().vmem_capacity_bytes >= (96 << 20):
            budget, vmem_limit, max_rows = 32 << 20, 64 << 20, 2048
    except Exception:
        pass
    return budget, vmem_limit, max_rows


def _pick_tile_rows(rows, lanes, in_itemsize, out_itemsize, budget, max_rows,
                    target_steps=8):
    """Row-tile from a VMEM budget; keep >= target_steps grid steps if possible."""
    # live bytes per row ≈ double-buffered (2 input + 3 output) slabs
    bytes_per_row = 2 * lanes * (2 * in_itemsize + 3 * out_itemsize)
    tn = (min(max_rows, budget // bytes_per_row) // 8) * 8
    tn = max(8, tn)
    # v7x: >=~8 grid steps so both TensorCores stream (and pipelining stays on).
    if rows >= 8 * target_steps:
        tn = min(tn, max(8, ((pl.cdiv(rows, target_steps) + 7) // 8) * 8))
    # no point exceeding the (8-rounded) problem size
    tn = min(tn, ((rows + 7) // 8) * 8)
    return tn


def reasoning_matrices(reasonings_pnc, *, out_dtype=None, torch_layout=False):
    """Pallas equivalent of ReasoningComponents.reasoning_matrices.

    Args:
      reasonings_pnc: (2, N, C) array — [p, n] slabs (see reasonings_to_pnc).
      out_dtype: optional output dtype (e.g. jnp.bfloat16 for a bf16 consumer).
      torch_layout: if True return torch-matching (N, 3, C) (extra copy);
        default returns (3, N, C), which is the zero-copy layout.

    matrices[j, n, c] (default) / matrices[n, j, c] (torch_layout) equals
    {pk, nk, ik}[j] computed from reasonings[n, c, :].
    """
    two, n_comp, n_classes = reasonings_pnc.shape
    assert two == 2, "expected (2, N, C) — use reasonings_to_pnc() once upfront"
    in_dtype = reasonings_pnc.dtype
    out_dtype = jnp.dtype(in_dtype if out_dtype is None else out_dtype)

    # Lane-dense flatten: the transform is purely elementwise, so when C is not
    # a lane-multiple but N*C is, view the problem as (N*C/128, 128) so every
    # store is a full unmasked 128-lane vst (free reshape on contiguous data).
    total = n_comp * n_classes
    if n_classes % 128 != 0 and total % 128 == 0:
        lanes, rows = 128, total // 128
        x = reasonings_pnc.reshape(2, rows, lanes)
    else:
        lanes, rows = n_classes, n_comp
        x = reasonings_pnc

    budget, vmem_limit, max_rows = _vmem_budget()
    tn = _pick_tile_rows(rows, lanes, jnp.dtype(in_dtype).itemsize,
                         out_dtype.itemsize, budget, max_rows)
    grid = (pl.cdiv(rows, tn),)   # ragged last block is masked by Pallas

    out = pl.pallas_call(
        _reasoning_matrices_kernel,
        out_shape=jax.ShapeDtypeStruct((3, rows, lanes), out_dtype),
        grid_spec=pltpu.PrefetchScalarGridSpec(
            num_scalar_prefetch=0,
            grid=grid,
            in_specs=[pl.BlockSpec((2, tn, lanes), lambda i: (0, i, 0))],
            out_specs=pl.BlockSpec((3, tn, lanes), lambda i: (0, i, 0)),
        ),
        compiler_params=pltpu.CompilerParams(
            dimension_semantics=("parallel",),
            vmem_limit_bytes=vmem_limit,
        ),
    )(x)

    out = out.reshape(3, n_comp, n_classes)
    if torch_layout:
        # Compatibility only: materializes an extra copy; prefer (3, N, C).
        out = jnp.transpose(out, (1, 0, 2))
    return out


# ---------------------------------------------------------------------------
# Deterministic parameter construction (stands in for the initializers).
# ---------------------------------------------------------------------------
def make_parameters(key, distribution, dim):
    """distribution: dict {class_label: num_components_for_class}."""
    num_classes = len(distribution)
    labels = jnp.concatenate(
        [jnp.full((n,), c, dtype=jnp.int32) for c, n in sorted(distribution.items())]
    )
    num_components = labels.shape[0]

    # Components: random-normal initializer stand-in (deterministic via key).
    components = jax.random.normal(key, (num_components, dim), dtype=jnp.float32)

    # Reasonings: PurePositiveReasoningsInitializer — positive reasoning = 1
    # for the component's own class, everything else (incl. negatives) = 0.
    pos = jax.nn.one_hot(labels, num_classes, dtype=jnp.float32)      # (N, C)
    neg = jnp.zeros_like(pos)                                         # (N, C)
    reasonings = jnp.stack([pos, neg], axis=-1)                       # (N, C, 2)
    return components, reasonings


def _reference_matrices(reasonings_nc2):
    """Pure-JAX transcription of the torch reasoning_matrices chain -> (N,3,C)."""
    a = jnp.clip(jnp.transpose(reasonings_nc2, (2, 1, 0)), 0.0, 1.0)   # (2, C, N)
    pk, b = a[0], a[1]
    nk = (1.0 - pk) * b
    ik = 1.0 - pk - nk
    return jnp.transpose(jnp.stack([pk, nk, ik], axis=-1), (1, 2, 0))  # (N, 3, C)


if __name__ == "__main__":
    key = jax.random.PRNGKey(0)

    # Small shapes consistent with the module: 4 classes, 2 components each.
    distribution = {0: 2, 1: 2, 2: 2, 3: 2}   # -> N = 8 components
    dim = 32                                   # feature dimension
    components, reasonings = make_parameters(key, distribution, dim)

    # forward(): returns the parameters untouched (no kernel launch).
    comp_out, reas_out = reasoning_components_forward(components, reasonings)
    assert comp_out.shape == components.shape and comp_out.dtype == components.dtype
    assert reas_out.shape == reasonings.shape and reas_out.dtype == reasonings.dtype
    assert bool(jnp.all(comp_out == components))
    assert bool(jnp.all(reas_out == reasonings))

    # One-time layout change (parameter creation time), outside the hot path.
    reasonings_pnc = reasonings_to_pnc(reasonings)            # (2, N, C)

    # Small case — torch-compatible (N, 3, C) output path.
    mats = reasoning_matrices(reasonings_pnc, torch_layout=True)
    jax.block_until_ready(mats)
    n_comp, n_classes = reasonings.shape[0], reasonings.shape[1]
    assert mats.shape == (n_comp, 3, n_classes)
    ref = _reference_matrices(reasonings)
    assert bool(jnp.allclose(mats, ref, atol=1e-6))

    # Larger lane-dense case — default (3, N, C) layout, multi-step parallel grid.
    big = jax.random.uniform(jax.random.PRNGKey(1), (2, 1024, 128),
                             dtype=jnp.float32, minval=-0.5, maxval=1.5)
    big_mats = reasoning_matrices(big)
    jax.block_until_ready(big_mats)
    big_ref = jnp.transpose(_reference_matrices(jnp.transpose(big, (1, 2, 0))),
                            (1, 0, 2))                         # (3, N, C)
    assert big_mats.shape == (3, 1024, 128)
    assert bool(jnp.allclose(big_mats, big_ref, atol=1e-6))

    # Ragged N exercising the cdiv grid / masked last block, plus bf16 output.
    rag = jax.random.uniform(jax.random.PRNGKey(2), (2, 1000, 256),
                             dtype=jnp.float32, minval=-0.5, maxval=1.5)
    rag_mats = reasoning_matrices(rag, out_dtype=jnp.bfloat16)
    jax.block_until_ready(rag_mats)
    rag_ref = jnp.transpose(_reference_matrices(jnp.transpose(rag, (1, 2, 0))),
                            (1, 0, 2))
    assert rag_mats.shape == (3, 1000, 256) and rag_mats.dtype == jnp.bfloat16
    assert bool(jnp.allclose(rag_mats.astype(jnp.float32), rag_ref, atol=1e-2))

    print("KERNEL_OK")
</pallas_src>

<mosaic_0001>
module attributes {stable_mosaic.version = 11 : i64} {
  func.func @_reasoning_matrices_kernel(%arg0: i32, %arg1: memref<2x8x4xf32, #tpu.memory_space<vmem>>, %arg2: memref<3x8x4xf32, #tpu.memory_space<vmem>>) attributes {dimension_semantics = [#tpu.dimension_semantics<parallel>], iteration_bounds = array<i64: 1>, scalar_prefetch = 0 : i64, scratch_operands = 0 : i64, tpu.core_type = #tpu.core_type<tc>, window_params = [{transform_indices = @transform_0, window_bounds = array<i64: 2, 8, 4>}, {transform_indices = @transform_1, window_bounds = array<i64: 3, 8, 4>}]} {
    %c0 = arith.constant 0 : index
    %c0_0 = arith.constant 0 : index
    %c0_1 = arith.constant 0 : index
    %0 = vector.load %arg1[%c0, %c0_0, %c0_1] : memref<2x8x4xf32, #tpu.memory_space<vmem>>, vector<1x8x4xf32>
    %1 = vector.shape_cast %0 : vector<1x8x4xf32> to vector<8x4xf32>
    %cst = arith.constant 0.000000e+00 : f32
    %cst_2 = arith.constant 1.000000e+00 : f32
    %2 = vector.broadcast %cst : f32 to vector<8x4xf32>
    %3 = arith.maximumf %2, %1 : vector<8x4xf32>
    %4 = vector.broadcast %cst_2 : f32 to vector<8x4xf32>
    %5 = arith.minimumf %4, %3 : vector<8x4xf32>
    %cst_3 = arith.constant 1.000000e+00 : f32
    %6 = vector.broadcast %cst_3 : f32 to vector<8x4xf32>
    %7 = arith.subf %6, %5 : vector<8x4xf32>
    %c1 = arith.constant 1 : index
    %c0_4 = arith.constant 0 : index
    %c0_5 = arith.constant 0 : index
    %8 = vector.load %arg1[%c1, %c0_4, %c0_5] : memref<2x8x4xf32, #tpu.memory_space<vmem>>, vector<1x8x4xf32>
    %9 = vector.shape_cast %8 : vector<1x8x4xf32> to vector<8x4xf32>
    %cst_6 = arith.constant 0.000000e+00 : f32
    %cst_7 = arith.constant 1.000000e+00 : f32
    %10 = vector.broadcast %cst_6 : f32 to vector<8x4xf32>
    %11 = arith.maximumf %10, %9 : vector<8x4xf32>
    %12 = vector.broadcast %cst_7 : f32 to vector<8x4xf32>
    %13 = arith.minimumf %12, %11 : vector<8x4xf32>
    %14 = arith.mulf %7, %13 : vector<8x4xf32>
    %c0_8 = arith.constant 0 : index
    %c0_9 = arith.constant 0 : index
    %c0_10 = arith.constant 0 : index
    %15 = vector.load %arg2[%c0_8, %c0_9, %c0_10] : memref<3x8x4xf32, #tpu.memory_space<vmem>>, vector<1x8x4xf32>
    %16 = vector.shape_cast %15 : vector<1x8x4xf32> to vector<8x4xf32>
    %17 = vector.shape_cast %5 : vector<8x4xf32> to vector<1x8x4xf32>
    tpu.vector_store %arg2[%c0_8, %c0_9, %c0_10], %17 {strides = array<i32>} : memref<3x8x4xf32, #tpu.memory_space<vmem>>, vector<1x8x4xf32>,
    %c1_11 = arith.constant 1 : index
    %c0_12 = arith.constant 0 : index
    %c0_13 = arith.constant 0 : index
    %18 = vector.load %arg2[%c1_11, %c0_12, %c0_13] : memref<3x8x4xf32, #tpu.memory_space<vmem>>, vector<1x8x4xf32>
    %19 = vector.shape_cast %18 : vector<1x8x4xf32> to vector<8x4xf32>
    %20 = vector.shape_cast %14 : vector<8x4xf32> to vector<1x8x4xf32>
    tpu.vector_store %arg2[%c1_11, %c0_12, %c0_13], %20 {strides = array<i32>} : memref<3x8x4xf32, #tpu.memory_space<vmem>>, vector<1x8x4xf32>,
    %cst_14 = arith.constant 1.000000e+00 : f32
    %21 = vector.broadcast %cst_14 : f32 to vector<8x4xf32>
    %22 = arith.subf %21, %5 : vector<8x4xf32>
    %23 = arith.subf %22, %14 : vector<8x4xf32>
    %c2 = arith.constant 2 : index
    %c0_15 = arith.constant 0 : index
    %c0_16 = arith.constant 0 : index
    %24 = vector.load %arg2[%c2, %c0_15, %c0_16] : memref<3x8x4xf32, #tpu.memory_space<vmem>>, vector<1x8x4xf32>
    %25 = vector.shape_cast %24 : vector<1x8x4xf32> to vector<8x4xf32>
    %26 = vector.shape_cast %23 : vector<8x4xf32> to vector<1x8x4xf32>
    tpu.vector_store %arg2[%c2, %c0_15, %c0_16], %26 {strides = array<i32>} : memref<3x8x4xf32, #tpu.memory_space<vmem>>, vector<1x8x4xf32>,
    return
  }
  func.func @transform_0(%arg0: i32) -> (i32, i32, i32) {
    %c0_i32 = arith.constant 0 : i32
    %c0_i32_0 = arith.constant 0 : i32
    %c0_i32_1 = arith.constant 0 : i32
    return %c0_i32, %arg0, %c0_i32_0 : i32, i32, i32
  }
  func.func @transform_1(%arg0: i32) -> (i32, i32, i32) {
    %c0_i32 = arith.constant 0 : i32
    %c0_i32_0 = arith.constant 0 : i32
    %c0_i32_1 = arith.constant 0 : i32
    return %c0_i32, %arg0, %c0_i32_0 : i32, i32, i32
  }
}

</mosaic_0001>

<bundles_post_ra>
// kernel: tpu_custom_call.1
= control target key start
LH: loop header
LB: loop body
LE: loop exit
PB: predicated region body
PF: predicated region fallthrough
CT: control target
= control target key end

     0   :  { %vm17_vm0 = vcmask 31744   ;;  %s56_s0 = inlined_call_operand.vmem [shape: f32[2,8,4], index: 0, kind: input, shape index: {}]   ;;  %s57_s1 = inlined_call_operand.vmem [shape: f32[3,8,4], index: 1, kind: output, shape index: {}]  }
   0x1   :  { %v8_v0 = vld [vmem:[%s56_s0] sm:$0xff]  ;;  %v28_v1 = vld [vmem:[%s56_s0 + $0x8] sm:$0xff] }
   0x2   :  { %v9_v2 = vmax.f32 %v8_v0, 0.0  ;;  %v14_v3 = vmax.f32 %v28_v1, 0.0 }
   0x4   :  { %v10_v4 = vmin.f32 %v9_v2, 1.0  ;;  %v15_v5 = vmin.f32 %v14_v3, 1.0 }
   0x6   :  { %18 = vst.msk [vmem:[%s57_s1] sm:$0xff] %vm17_vm0, %v10_v4  ;;  %v11_v6 = vsub.f32 1.0, %v10_v4 }
   0x8   :  { %v16_v7 = vmul.f32 %v15_v5, %v11_v6 }
   0xa   :  { %29 = vst.msk [vmem:[%s57_s1 + $0x8] sm:$0xff] %vm17_vm0, %v16_v7  ;;  %v21_v8 = vsub.f32 %v11_v6, %v16_v7 }
   0xc   :  { %30 = vst.msk [vmem:[%s57_s1 + $0x10] sm:$0xff] %vm17_vm0, %v21_v8 }

</bundles_post_ra>
